<compile_context>
chip_gen: v6e
topology: v6e:2x2x1
jax: 0.10.0
libtpu: 0.0.40
codegen_flags: <defaults>
</compile_context>

<pallas_src>
import functools

import jax
import jax.numpy as jnp
from jax.experimental import pallas as pl
from jax.experimental.pallas import tpu as pltpu


def _round_up(a, b):
    return ((a + b - 1) // b) * b


def _round_down(a, b):
    return (a // b) * b


def _choose_tiles(n, c):
    """Pick (TILE_N, TILE_C) that (a) respect the (8,128) layout rules,
    (b) prefer exact division of N / C so ragged-tile masking compiles away,
    (c) keep the x tile ~4 MiB (double-buffered ~8 MiB), and (d) keep several
    row tiles for large N so the 'parallel' row axis can feed both v7x TCs."""
    # ---- columns ----
    c_cap = 4096
    if c <= c_cap:
        tile_c = c                            # full extent -> no col mask
    else:
        tile_c = None
        t = _round_down(c_cap, 128)
        while t >= 128:
            if c % t == 0:                    # exact divisor -> no col mask
                tile_c = t
                break
            t -= 128
        if tile_c is None:
            tile_c = 2048                     # ragged last col tile (masked)

    # ---- rows ----
    # ~4 MiB f32 x tile budget; cap at 1024 so the lane-padded target block
    # stays <= 512 KiB per buffer, and cap at ~N/8 so grid_rows >= 8 when N
    # is large (megacore / v7x 2-TC sharding).
    budget_rows = max(8, _round_down((4 << 20) // (4 * tile_c), 8))
    mega_cap = max(8, _round_up(-(-n // 8), 8))
    cap = max(8, min(budget_rows, 1024, mega_cap))
    if n <= cap:
        tile_n = n                            # full extent -> no row mask
    else:
        tile_n = None
        t = _round_down(cap, 8)
        while t >= 8:
            if n % t == 0:                    # exact divisor -> no row mask
                tile_n = t
                break
            t -= 8
        if tile_n is None:
            tile_n = _round_down(cap, 8)      # ragged last row tile (masked)
    return tile_n, tile_c


def _ls_bce_kernel(x_ref, tgt_ref, out_ref, *, smoothing, n_rows, n_cols,
                   mask_rows, mask_cols):
    i = pl.program_id(0)          # row-tile index  ("parallel")
    j = pl.program_id(1)          # col-tile index  (reduction, "arbitrary")

    tn, tc = x_ref.shape
    confidence = 1.0 - smoothing
    uniform = smoothing / n_cols              # hoisted static constant s / C

    # Stream logits in native dtype; upcast in-register.
    x = x_ref[...].astype(jnp.float32)

    # Column coordinates (needed for the one-hot compare regardless of mask).
    g_cols = jax.lax.broadcasted_iota(jnp.int32, (tn, tc), 1) + j * tc

    # Fused per-element term: softplus(x) - x * (uniform + confidence*onehot)
    # softplus(x) = max(x,0) + log1p(exp(-|x|))   (numerically stable)
    sp = jnp.maximum(x, 0.0) + jnp.log1p(jnp.exp(-jnp.abs(x)))
    # TODO(synk): on v6e/v7x the EUP transcendentals could run in bf16 (~2x
    # EUP rate, ~1e-3 rel. loss error); kept f32 to match the reference.
    coeff = jnp.where(g_cols == tgt_ref[...], confidence + uniform, uniform)
    term = sp - x * coeff

    # Ragged-tile masking — statically compiled out for exactly-tiling shapes.
    # A single select on the final term also drops any NaN/Inf garbage sitting
    # in the padded region of a last tile.
    if mask_rows or mask_cols:
        valid = None
        if mask_rows:
            g_rows = jax.lax.broadcasted_iota(jnp.int32, (tn, tc), 0) + i * tn
            valid = g_rows < n_rows
        if mask_cols:
            vcols = g_cols < n_cols
            valid = vcols if valid is None else (valid & vcols)
        term = jnp.where(valid, term, 0.0)

    partial = jnp.sum(term)                   # single fused reduction per tile

    # Lane-dense (1,8,128) per-row-tile accumulator; block resident across j
    # (same output block index for every j), so this is a race-free on-chip
    # accumulation even with the "parallel" row axis.
    @pl.when(j == 0)
    def _():
        out_ref[...] = jnp.zeros_like(out_ref)

    out_ref[...] += partial


def label_smoothing_bce_with_logits(x, target, smoothing=0.1):
    """x: (N, C) float logits, target: (N,) integer class indices.
    Pass x in its native dtype (e.g. bf16); the kernel upcasts in-register."""
    assert smoothing < 1.0
    n, c = x.shape
    tile_n, tile_c = _choose_tiles(n, c)
    grid_rows = pl.cdiv(n, tile_n)
    grid_cols = pl.cdiv(c, tile_c)

    tgt2d = target.astype(jnp.int32).reshape(n, 1)

    kernel = functools.partial(
        _ls_bce_kernel, smoothing=float(smoothing), n_rows=n, n_cols=c,
        mask_rows=(n % tile_n != 0), mask_cols=(c % tile_c != 0))

    partials = pl.pallas_call(
        kernel,
        out_shape=jax.ShapeDtypeStruct((grid_rows, 8, 128), jnp.float32),
        grid=(grid_rows, grid_cols),
        in_specs=[
            # x streamed as ~4 MiB (tile_n, tile_c) blocks (double-buffered).
            # TODO(synk): sweep pipeline_mode=pl.Buffered(3) on v7x.
            pl.BlockSpec((tile_n, tile_c), lambda i, j: (i, j)),
            # Targets ride along as a small (tile_n, 1) int32 block; only
            # re-DMA'd when the row tile changes.  tile_n is capped so the
            # lane-padded VMEM footprint stays <= 512 KiB per buffer.
            pl.BlockSpec((tile_n, 1), lambda i, j: (i, 0)),
        ],
        out_specs=pl.BlockSpec((1, 8, 128), lambda i, j: (i, 0, 0)),
        compiler_params=pltpu.CompilerParams(
            dimension_semantics=("parallel", "arbitrary"),
            vmem_limit_bytes=48 * 1024 * 1024),
    )(x, tgt2d)

    # NOTE: every element of a row tile's (8,128) block holds the SAME partial
    # sum; read exactly one lane per row tile (summing all lanes would
    # over-count by 1024x).
    return jnp.sum(partials[:, 0, 0]) / (n * c)


def _reference(x, target, smoothing=0.1):
    """Pure-JAX reference mirroring the PyTorch module exactly."""
    c = x.shape[-1]
    confidence = 1.0 - smoothing
    one_hot = jnp.eye(c, dtype=x.dtype)[target]
    nll = jnp.ones_like(x) / c

    def bce(logits, t):
        elem = (jnp.maximum(logits, 0.0) - logits * t
                + jnp.log1p(jnp.exp(-jnp.abs(logits))))
        return jnp.mean(elem)

    return bce(x, one_hot) * confidence + bce(x, nll) * smoothing


if __name__ == "__main__":
    key = jax.random.PRNGKey(0)
    kx, kt = jax.random.split(key)

    N, C = 8, 16  # small (batch, num_classes) consistent with the module
    x = jax.random.normal(kx, (N, C), dtype=jnp.float32)
    target = jax.random.randint(kt, (N,), 0, C, dtype=jnp.int32)

    out = label_smoothing_bce_with_logits(x, target, smoothing=0.1)
    out = jax.block_until_ready(out)

    ref = _reference(x, target, smoothing=0.1)
    assert jnp.allclose(out, ref, rtol=1e-5, atol=1e-5), (out, ref)

    print("KERNEL_OK")
</pallas_src>

<mosaic_0001>
module attributes {stable_mosaic.version = 11 : i64} {
  func.func @_ls_bce_kernel(%arg0: i32, %arg1: i32, %arg2: memref<8x16xf32, #tpu.memory_space<vmem>>, %arg3: memref<8x1xi32, #tpu.memory_space<vmem>>, %arg4: memref<1x8x128xf32, #tpu.memory_space<vmem>>) attributes {dimension_semantics = [#tpu.dimension_semantics<parallel>, #tpu.dimension_semantics<arbitrary>], iteration_bounds = array<i64: 1, 1>, scalar_prefetch = 0 : i64, scratch_operands = 0 : i64, tpu.core_type = #tpu.core_type<tc>, window_params = [{transform_indices = @transform_0, window_bounds = array<i64: 8, 16>}, {transform_indices = @transform_1, window_bounds = array<i64: 8, 1>}, {transform_indices = @transform_2, window_bounds = array<i64: 1, 8, 128>}]} {
    %c0 = arith.constant 0 : index
    %c0_0 = arith.constant 0 : index
    %0 = vector.load %arg2[%c0, %c0_0] : memref<8x16xf32, #tpu.memory_space<vmem>>, vector<8x16xf32>
    %1 = tpu.iota {dimensions = array<i32: 1>} : vector<8x16xi32>
    %c16_i32 = arith.constant 16 : i32
    %2 = arith.muli %arg1, %c16_i32 : i32
    %3 = vector.broadcast %2 : i32 to vector<8x16xi32>
    %4 = arith.addi %1, %3 : vector<8x16xi32>
    %cst = arith.constant 0.000000e+00 : f32
    %5 = vector.broadcast %cst : f32 to vector<8x16xf32>
    %6 = arith.maximumf %0, %5 : vector<8x16xf32>
    %7 = math.absf %0 : vector<8x16xf32>
    %cst_1 = arith.constant 0.000000e+00 : f32
    %8 = vector.broadcast %cst_1 : f32 to vector<8x16xf32>
    %9 = arith.subf %8, %7 : vector<8x16xf32>
    %10 = math.exp %9 : vector<8x16xf32>
    %11 = math.log1p %10 : vector<8x16xf32>
    %12 = arith.addf %6, %11 : vector<8x16xf32>
    %c0_2 = arith.constant 0 : index
    %c0_3 = arith.constant 0 : index
    %13 = vector.load %arg3[%c0_2, %c0_3] : memref<8x1xi32, #tpu.memory_space<vmem>>, vector<8x1xi32>
    %14 = vector.broadcast %13 : vector<8x1xi32> to vector<8x16xi32>
    %15 = arith.cmpi eq, %4, %14 : vector<8x16xi32>
    %cst_4 = arith.constant 9.062500e-01 : f32
    %cst_5 = arith.constant 6.250000e-03 : f32
    %16 = vector.broadcast %cst_4 : f32 to vector<8x16xf32>
    %17 = vector.broadcast %cst_5 : f32 to vector<8x16xf32>
    %18 = arith.select %15, %16, %17 : vector<8x16xi1>, vector<8x16xf32>
    %19 = arith.mulf %0, %18 : vector<8x16xf32>
    %20 = arith.subf %12, %19 : vector<8x16xf32>
    %21 = vector.shape_cast %20 : vector<8x16xf32> to vector<1x8x16xf32>
    %cst_6 = arith.constant dense<0.000000e+00> : vector<1xf32>
    %22 = vector.multi_reduction <add>, %21, %cst_6 [1, 2] : vector<1x8x16xf32> to vector<1xf32>
    %23 = vector.shape_cast %22 : vector<1xf32> to vector<1x1x1xf32>
    %24 = vector.extract %23[0, 0, 0] : f32 from vector<1x1x1xf32>
    %c0_i32 = arith.constant 0 : i32
    %25 = arith.cmpi eq, %arg1, %c0_i32 : i32
    %26 = arith.extui %25 : i1 to i32
    %c0_i32_7 = arith.constant 0 : i32
    %27 = arith.cmpi ne, %26, %c0_i32_7 : i32
    scf.if %27 {
      %cst_14 = arith.constant 0.000000e+00 : f32
      %32 = vector.broadcast %cst_14 : f32 to vector<1x8x128xf32>
      %c0_15 = arith.constant 0 : index
      %c0_16 = arith.constant 0 : index
      %c0_17 = arith.constant 0 : index
      %33 = vector.load %arg4[%c0_15, %c0_16, %c0_17] : memref<1x8x128xf32, #tpu.memory_space<vmem>>, vector<1x8x128xf32>
      tpu.vector_store %arg4[%c0_15, %c0_16, %c0_17], %32 {strides = array<i32>} : memref<1x8x128xf32, #tpu.memory_space<vmem>>, vector<1x8x128xf32>,
    } else {
    }
    %c0_8 = arith.constant 0 : index
    %c0_9 = arith.constant 0 : index
    %c0_10 = arith.constant 0 : index
    %28 = vector.load %arg4[%c0_8, %c0_9, %c0_10] : memref<1x8x128xf32, #tpu.memory_space<vmem>>, vector<1x8x128xf32>
    %29 = vector.broadcast %24 : f32 to vector<1x8x128xf32>
    %30 = arith.addf %28, %29 : vector<1x8x128xf32>
    %c0_11 = arith.constant 0 : index
    %c0_12 = arith.constant 0 : index
    %c0_13 = arith.constant 0 : index
    %31 = vector.load %arg4[%c0_11, %c0_12, %c0_13] : memref<1x8x128xf32, #tpu.memory_space<vmem>>, vector<1x8x128xf32>
    tpu.vector_store %arg4[%c0_11, %c0_12, %c0_13], %30 {strides = array<i32>} : memref<1x8x128xf32, #tpu.memory_space<vmem>>, vector<1x8x128xf32>,
    return
  }
  func.func @transform_0(%arg0: i32, %arg1: i32) -> (i32, i32) {
    %c0_i32 = arith.constant 0 : i32
    return %arg0, %arg1 : i32, i32
  }
  func.func @transform_1(%arg0: i32, %arg1: i32) -> (i32, i32) {
    %c0_i32 = arith.constant 0 : i32
    %c0_i32_0 = arith.constant 0 : i32
    return %arg0, %c0_i32 : i32, i32
  }
  func.func @transform_2(%arg0: i32, %arg1: i32) -> (i32, i32, i32) {
    %c0_i32 = arith.constant 0 : i32
    %c0_i32_0 = arith.constant 0 : i32
    %c0_i32_1 = arith.constant 0 : i32
    return %arg0, %c0_i32, %c0_i32_0 : i32, i32, i32
  }
}

</mosaic_0001>

<bundles_post_ra>
// kernel: tpu_custom_call.1
= control target key start
LH: loop header
LB: loop body
LE: loop exit
PB: predicated region body
PF: predicated region fallthrough
CT: control target
= control target key end

     0   :  { %v108_v1 = vmov 0   ;;  %s135_s0 = inlined_call_operand.vmem [shape: f32[8,16], index: 0, kind: input, shape index: {}]   ;;  %s136_s1 = inlined_call_operand.vmem [shape: s32[8,1], index: 1, kind: input, shape index: {}]   ;;  %s137_s2 = inlined_call_operand.hbm [shape: f32[1,8,128], index: 2, kind: output, shape index: {}]  }
   0x1   :  { %v33_v0 = vld [vmem:[%s136_s1] sm:$0xff]  ;;  %81 = vset.pattern.permute.xlu0 %v108_v1 }
   0x2   :  { %7 = vsyncpa [#allocation3], 0  ;;  %35 = vperm.xlu0 %81, %v33_v0   ;;  %v12_v2 = vld [vmem:[%s135_s0] sm:$0xff]  ;;  %v13_v12 = vlaneseq  ;;  %v109_v20 = vmov 0.00625   ;;  %vm41_vm2 = vcmask 130048  }
   0x3   :  { %v19_v3 = vand.u32 2147483647, %v12_v2  ;;  %v18_v16 = vmax.f32 %v12_v2, 0.0  ;;  %s110_s0 = smov [#allocation2]  }
   0x4   :  { %v14_v15 = vand.u32 127, %v13_v12  ;;  %s67_s1 = sshll.u32 %s110_s0, 4  ;;  %s68_s1 = int_to_ptr.vmem [resolvable:$true] %s67_s1 }
   0x5   :  { %v20_v4 = vsub.f32 0.0, %v19_v3  ;;  %s86_s14 = scalar_lea.vmem %s68_s1, 128  ;;  %p91_p1 = scmp.lt.s32.totalorder %s68_s1, %s68_s1 }
   0x6   :  { %p87_p0 = scmp.ne.s32.totalorder %s68_s1, %s86_s14  ;;  %p92_p2 = scmp.lt.s32.totalorder %s86_s14, %s86_s14 }
   0x7   :  { %v21_v5 = vmul.f32 1.442695, %v20_v4 }
   0x8   :  { %p93_p3 = por %p92_p2, %p91_p1 }
   0x9   :  { %82 = vpow2.f32 %v21_v5 }
   0xa   :  { %p94_p4 = pnand %p93_p3, %p87_p0 }
  0x16   :  { %v83_v6 = vpop.eup %82 }
  0x17   :  { %v23_v7 = vadd.f32 1.0, %v83_v6  ;;  %v26_v8 = vmul.f32 -0.5, %v83_v6  ;;  %v29_v11 = vand.u32 2147483647, %v83_v6 }
  0x19   :  { %84 = vlog2.f32 %v23_v7  ;;  %v27_v9 = vadd.f32 1.0, %v26_v8  ;;  %vm30_vm0 = vcmp.lt.f32.partialorder %v29_v11, 0.0004427343 }
  0x1b   :  { %v28_v14 = vmul.f32 %v83_v6, %v27_v9 }
  0x26   :  { %v85_v10 = vpop.eup %84 }
  0x27   :  { %v25_v13 = vmul.f32 0.6931472, %v85_v10 }
  0x29   :  { %v31_v17 = vsel %vm30_vm0, %v28_v14, %v25_v13 }
  0x2a   :  { %v32_v19 = vadd.f32 %v31_v17, %v18_v16 }
  0x7d   :  { %v36_v18 = vpop.permute.xlu0 %35 }
  0x7e   :  { %vm37_vm1 = vcmp.eq.s32.totalorder %v14_v15, %v36_v18 }
  0x7f   :  { %v38_v21 = vsel %vm37_vm1, 0.90625, %v109_v20 }
  0x80   :  { %v39_v22 = vmul.f32 %v38_v21, %v12_v2 }
  0x82   :  { %v40_v23 = vsub.f32 %v32_v19, %v39_v22 }
  0x84   :  { %v42_v24 = vsel %vm41_vm2, %v40_v23, 0.0 }
  0x85   :  { %43 = vadd.xlane.f32.xlu0 %v42_v24 }
 0x10e   :  { %v44_v25 = vpop.xlane.xlu0 %43 }
 0x10f   :  { %v45_v26 = vrot.slane %v44_v25, 4 }
 0x111   :  { %v46_v27 = vadd.f32 %v45_v26, %v44_v25 }
 0x113   :  { %v47_v28 = vrot.slane %v46_v27, 2 }
 0x115   :  { %v48_v29 = vadd.f32 %v47_v28, %v46_v27 }
 0x117   :  { %v49_v30 = vrot.slane %v48_v29, 1 }
 0x119   :  { %v50_v31 = vadd.f32 %v49_v30, %v48_v29 }
 0x11b   :  { %75 = vpush %v50_v31 }
 0x14c   :  { %s76_s13 = spop %75 }
 0x14d   :  { %v58_v32 = vstv %s76_s13 }
 0x14e   :  { %60 = vst [vmem:[#allocation2] sm:$0xff] %v58_v32 }
 0x14f   :  { %97 = shalt.err (!%p94_p4)
}
 0x150   :  { %70 = dma.vmem_to_hbm [thread:$0]  %s68_s1, 128, %s137_s2, [#allocation3]  }
 0x151   :  { %106 = dma.done.wait [#allocation3], 128  }
 0x152   :  { %107 = vsyncadd [#allocation3], 4294967168 }
 0x153   :  { %74 = vsyncpa [#allocation3], 1 }

</bundles_post_ra>
